<compile_context>
chip_gen: v7x
topology: tpu7x:2x2x1
jax: 0.10.0
libtpu: 0.0.40
codegen_flags: <defaults>
</compile_context>

<pallas_src>
import math
import jax
import jax.numpy as jnp
from jax.experimental import pallas as pl
from jax.experimental.pallas import tpu as pltpu


def _build_pe_table(d_model: int, max_len: int = 512) -> jnp.ndarray:
    """Plain-JAX parameter setup (glue), identical to the PyTorch __init__."""
    position = jnp.arange(0, max_len, dtype=jnp.float32)[:, None]             # (max_len, 1)
    div_term = jnp.exp(
        jnp.arange(0, d_model, 2, dtype=jnp.float32) * (-math.log(10000.0) / d_model)
    )                                                                          # (d_model//2,)
    angles = position * div_term                                               # (max_len, d_model//2)
    pe = jnp.zeros((max_len, d_model), dtype=jnp.float32)
    pe = pe.at[:, 0::2].set(jnp.sin(angles))
    pe = pe.at[:, 1::2].set(jnp.cos(angles))
    return pe                                                                  # (max_len, d_model)


def _pe_add_kernel(x_ref, pe_ref, o_ref):
    # x_ref/o_ref: (TB, TR, L) slab; pe_ref: (TR, L) slab shared by every batch
    # in the block (VPU broadcast add).  Compute in f32, cast only on store.
    o_ref[...] = (x_ref[...].astype(jnp.float32) + pe_ref[...]).astype(o_ref.dtype)


def _largest_aligned_divisor(n: int, unit: int, cap: int) -> int:
    """Largest d with d % unit == 0, d | n, d <= cap.  0 if none exists."""
    best = 0
    cap = min(cap, n)
    for d in range(unit, cap + 1, unit):
        if n % d == 0:
            best = d
    return best


def _largest_divisor(n: int, cap: int) -> int:
    """Largest divisor of n that is <= cap (>= 1)."""
    for d in range(max(1, min(n, cap)), 0, -1):
        if n % d == 0:
            return d
    return 1


def _default_block_bytes() -> int:
    """Per-generation slab budget.  v7x (64 MiB VMEM, ~3.2 TB/s HBM) wants bigger
    slabs to amortize per-grid-step overhead; v5e/v6e are already near roofline
    at a few MiB."""
    try:
        info = pltpu.get_tpu_info()
        vmem = getattr(info, "vmem_capacity_bytes", None)
        if vmem is not None and vmem <= (64 << 20):
            return 6 << 20
    except Exception:
        pass
    return 4 << 20


def positional_encoding_forward(
    x: jnp.ndarray, pe_table: jnp.ndarray, *, block_bytes: int | None = None
) -> jnp.ndarray:
    """x: (B, S, D); pe_table: (max_len, D) float32. Returns x + pe[None, :S, :]."""
    B, S, D = x.shape
    if block_bytes is None:
        block_bytes = _default_block_bytes()

    out_dtype = jnp.promote_types(x.dtype, pe_table.dtype)   # PyTorch promotion
    x_item = jnp.dtype(x.dtype).itemsize
    out_item = jnp.dtype(out_dtype).itemsize
    pe_item = jnp.dtype(pe_table.dtype).itemsize

    P = S * D                                   # per-batch element count (pe period)
    sub = 8 * max(1, 4 // x_item)               # sublane unit: 8 f32 / 16 bf16 / 32 int8
    budget_elems = max(sub * 128, block_bytes // max(out_item, x_item))

    # --- choose the (M, L) view of one batch-plane ------------------------------
    # L: multiple of 128 dividing S*D (unmasked, lane-dense stores), capped so the
    # plane keeps >= `sub` rows when possible (full sublanes per vreg).
    lane_cap = max(128, min(budget_elems // sub, max(128, P // sub)))
    L = _largest_aligned_divisor(P, 128, lane_cap)
    if L == 0:
        M, L = S, D                             # S*D not a multiple of 128: natural view
    else:
        M = P // L

    # --- row tile (cdiv grid: last block may be ragged, Pallas masks it) --------
    tr_target = max(1, budget_elems // max(1, L))
    if tr_target >= M:
        TR = M
    else:
        TR = min(M, max(sub, (tr_target // sub) * sub))

    # --- group batches into one block when a whole plane is below budget --------
    plane = M * L
    TB = 1
    if TR == M and B > 1 and plane <= budget_elems:
        TB = _largest_divisor(B, max(1, budget_elems // plane))

    nm = pl.cdiv(M, TR)
    nb = B // TB                                # TB divides B by construction

    # pe view for this S.  NOTE(perf): in a persistent module this tiny slice +
    # reshape should be cached at init keyed on (S, M, L); it stays off the kernel
    # hot path either way and is negligible relative to x.
    pe_v = pe_table[:S, :].reshape(M, L)        # kept in f32 (no pre-add downcast)
    x_v = x.reshape(B, M, L)

    xb = TB * TR * L * x_item
    ob = TB * TR * L * out_item
    peb = TR * L * pe_item
    # Explicit scoped-VMEM limit covering double-buffered in + out + pe with
    # headroom, so larger slabs never trip the per-generation default limits.
    vmem_limit = int(min(max(32 << 20, 2.5 * (xb + ob + peb)), 56 << 20))

    # Memory-bound: one add/elem; bytes = read x + write out + read pe once.
    cost = pl.CostEstimate(
        flops=B * P,
        transcendentals=0,
        bytes_accessed=B * P * (x_item + out_item) + P * pe_item,
    )

    out_v = pl.pallas_call(
        _pe_add_kernel,
        out_shape=jax.ShapeDtypeStruct((B, M, L), out_dtype),
        grid_spec=pltpu.PrefetchScalarGridSpec(
            num_scalar_prefetch=0,
            # row axis OUTER, batch axis INNER: the pe block index depends only on
            # the outer axis, so pe is DMA'd once per row tile and stays resident
            # in VMEM across all inner batch steps.
            grid=(nm, nb),
            in_specs=[
                pl.BlockSpec((TB, TR, L), lambda m, b: (b, m, 0)),   # x slab
                pl.BlockSpec((TR, L), lambda m, b: (m, 0)),          # shared pe slab
            ],
            out_specs=pl.BlockSpec((TB, TR, L), lambda m, b: (b, m, 0)),
        ),
        compiler_params=pltpu.CompilerParams(
            dimension_semantics=("parallel", "parallel"),   # both axes independent (megacore)
            vmem_limit_bytes=vmem_limit,
        ),
        cost_estimate=cost,
    )(x_v, pe_v)

    return out_v.reshape(B, S, D)


if __name__ == "__main__":
    MAX_LEN = 512
    key = jax.random.PRNGKey(0)

    # 1) primary check: the module's toy shape (batch=2, seq=8, d_model=32) -------
    B, S, D = 2, 8, 32
    pe = _build_pe_table(D, MAX_LEN)
    x = jax.random.normal(key, (B, S, D), dtype=jnp.float32)
    out = jax.block_until_ready(positional_encoding_forward(x, pe))
    ref = x + pe[None, :S, :]
    assert out.shape == ref.shape and out.dtype == ref.dtype
    assert jnp.allclose(out, ref, atol=1e-6), "mismatch vs reference (toy shape)"

    # 2) batch-grouped blocks (TB>1), full (8,128)-aligned sublane/lane tiles -----
    B2, S2, D2 = 16, 64, 64
    pe2 = _build_pe_table(D2, MAX_LEN)
    x2 = jax.random.normal(jax.random.PRNGKey(1), (B2, S2, D2), dtype=jnp.float32)
    out2 = jax.block_until_ready(positional_encoding_forward(x2, pe2, block_bytes=64 * 1024))
    ref2 = x2 + pe2[None, :S2, :]
    assert jnp.allclose(out2, ref2, atol=1e-6), "mismatch vs reference (batched tiles)"

    # 3) multi-step row grid with a ragged (masked) last block + pe residency -----
    B3, S3, D3 = 3, 40, 96           # S*D = 3840 = 30*128 -> L=256, M=15, TR=8 (ragged)
    pe3 = _build_pe_table(D3, MAX_LEN)
    x3 = jax.random.normal(jax.random.PRNGKey(2), (B3, S3, D3), dtype=jnp.float32)
    out3 = jax.block_until_ready(positional_encoding_forward(x3, pe3, block_bytes=8 * 1024))
    ref3 = x3 + pe3[None, :S3, :]
    assert jnp.allclose(out3, ref3, atol=1e-6), "mismatch vs reference (ragged tiles)"

    # 4) S*D not a multiple of 128 -> natural (S, D) fallback view ----------------
    B4, S4, D4 = 2, 8, 20
    pe4 = _build_pe_table(D4, MAX_LEN)
    x4 = jax.random.normal(jax.random.PRNGKey(3), (B4, S4, D4), dtype=jnp.float32)
    out4 = jax.block_until_ready(positional_encoding_forward(x4, pe4))
    ref4 = x4 + pe4[None, :S4, :]
    assert jnp.allclose(out4, ref4, atol=1e-6), "mismatch vs reference (fallback view)"

    # 5) bf16 input: f32 add, PyTorch-style promotion to f32 output ---------------
    x5 = x.astype(jnp.bfloat16)
    out5 = jax.block_until_ready(positional_encoding_forward(x5, pe))
    ref5 = x5.astype(jnp.float32) + pe[None, :S, :]
    assert out5.dtype == jnp.float32
    assert jnp.allclose(out5, ref5, atol=1e-6), "mismatch vs reference (bf16 promotion)"

    print("KERNEL_OK")
</pallas_src>

<mosaic_0001>
module attributes {stable_mosaic.version = 11 : i64} {
  func.func @_pe_add_kernel(%arg0: i32, %arg1: i32, %arg2: memref<2x2x128xf32, #tpu.memory_space<vmem>>, %arg3: memref<2x128xf32, #tpu.memory_space<vmem>>, %arg4: memref<2x2x128xf32, #tpu.memory_space<vmem>>) attributes {dimension_semantics = [#tpu.dimension_semantics<parallel>, #tpu.dimension_semantics<parallel>], iteration_bounds = array<i64: 1, 1>, scalar_prefetch = 0 : i64, scratch_operands = 0 : i64, tpu.core_type = #tpu.core_type<tc>, window_params = [{transform_indices = @transform_0, window_bounds = array<i64: 2, 2, 128>}, {transform_indices = @transform_1, window_bounds = array<i64: 2, 128>}, {transform_indices = @transform_2, window_bounds = array<i64: 2, 2, 128>}]} {
    %c0 = arith.constant 0 : index
    %c0_0 = arith.constant 0 : index
    %c0_1 = arith.constant 0 : index
    %0 = vector.load %arg2[%c0, %c0_0, %c0_1] : memref<2x2x128xf32, #tpu.memory_space<vmem>>, vector<2x2x128xf32>
    %c0_2 = arith.constant 0 : index
    %c0_3 = arith.constant 0 : index
    %1 = vector.load %arg3[%c0_2, %c0_3] : memref<2x128xf32, #tpu.memory_space<vmem>>, vector<2x128xf32>
    %2 = vector.shape_cast %1 : vector<2x128xf32> to vector<1x2x128xf32>
    %3 = vector.broadcast %2 : vector<1x2x128xf32> to vector<2x2x128xf32>
    %4 = arith.addf %0, %3 : vector<2x2x128xf32>
    %c0_4 = arith.constant 0 : index
    %c0_5 = arith.constant 0 : index
    %c0_6 = arith.constant 0 : index
    %5 = vector.load %arg4[%c0_4, %c0_5, %c0_6] : memref<2x2x128xf32, #tpu.memory_space<vmem>>, vector<2x2x128xf32>
    tpu.vector_store %arg4[%c0_4, %c0_5, %c0_6], %4 {strides = array<i32>} : memref<2x2x128xf32, #tpu.memory_space<vmem>>, vector<2x2x128xf32>,
    return
  }
  func.func @transform_0(%arg0: i32, %arg1: i32) -> (i32, i32, i32) {
    %c0_i32 = arith.constant 0 : i32
    %c0_i32_0 = arith.constant 0 : i32
    return %arg1, %arg0, %c0_i32 : i32, i32, i32
  }
  func.func @transform_1(%arg0: i32, %arg1: i32) -> (i32, i32) {
    %c0_i32 = arith.constant 0 : i32
    %c0_i32_0 = arith.constant 0 : i32
    return %arg0, %c0_i32 : i32, i32
  }
  func.func @transform_2(%arg0: i32, %arg1: i32) -> (i32, i32, i32) {
    %c0_i32 = arith.constant 0 : i32
    %c0_i32_0 = arith.constant 0 : i32
    return %arg1, %arg0, %c0_i32 : i32, i32, i32
  }
}

</mosaic_0001>

<bundles_post_ra>
// kernel: tpu_custom_call.1
= control target key start
LH: loop header
LB: loop body
LE: loop exit
PB: predicated region body
PF: predicated region fallthrough
CT: control target
= control target key end

     0   :  { %7 = vsyncpa [#allocation3], 0  ;;  %s154_s0 = inlined_call_operand.hbm [shape: f32[2,2,128], index: 0, kind: input, shape index: {}]   ;;  %s155_s1 = inlined_call_operand.vmem [shape: f32[2,128], index: 1, kind: input, shape index: {}]   ;;  %s156_s2 = inlined_call_operand.hbm [shape: f32[2,2,128], index: 2, kind: output, shape index: {}]  }
   0x1   :  { %8 = vsyncpa [#allocation4], 0  ;;  %s102_s9 = smov [#allocation2]   ;;  %s54_s13 = scalar_lea.hbm %s154_s0, 64 }
   0x2   :  { %s14_s10 = sshll.u32 %s102_s9, 4  ;;  %p55_p0 = scmp.ne.s32.totalorder %s154_s0, %s54_s13  ;;  %s15_s10 = int_to_ptr.vmem [resolvable:$true] %s14_s10 }
   0x3   :  { %p58_p1 = scmp.lt.u32.totalorder %s54_s13, %s154_s0 }
   0x5   :  { %p60_p2 = pnand %p58_p1, %p55_p0 }
   0x7   :  { %63 = shalt.err (!%p60_p2)
}
   0x8   :  { %s64_s18 = scalar_lea.vmem %s15_s10, 64  ;;  %p69_p4 = scmp.lt.s32.totalorder %s15_s10, %s15_s10 }
   0x9   :  { %p65_p3 = scmp.ne.s32.totalorder %s15_s10, %s64_s18  ;;  %p70_p5 = scmp.lt.s32.totalorder %s64_s18, %s64_s18 }
   0xb   :  { %p71_p6 = por %p70_p5, %p69_p4 }
   0xd   :  { %p72_p7 = pnand %p71_p6, %p65_p3 }
   0xf   :  { %75 = shalt.err (!%p72_p7)
}
  0x10   :  { %s103_s19 = smov 32   ;;  %s104_s20 = smov 2  }
  0x11   :  { %20 = dma.hbm_to_vmem [thread:$0]  %s154_s0, 64, %s15_s10, [#allocation3], %s103_s19, %s103_s19, %s104_s20  }
  0x12   :  { %98 = dma.done.wait [#allocation3], 64  }
  0x13   :  { %99 = vsyncadd [#allocation3], 4294967232  ;;  %s105_s23 = smov [#allocation5]   ;;  %v26_v0 = vld [vmem:[#allocation2] sm:$0x3] }
  0x14   :  { %s38_s24 = sshll.u32 %s105_s23, 4  ;;  %v28_v1 = vld [vmem:[%s155_s1] sm:$0x3]  ;;  %v27_v2 = vld [vmem:[#allocation2 + $0x2] sm:$0x3]  ;;  %s39_s24 = int_to_ptr.vmem [resolvable:$true] %s38_s24 }
  0x15   :  { %v29_v3 = vadd.f32 %v28_v1, %v26_v0  ;;  %v30_v4 = vadd.f32 %v28_v1, %v27_v2  ;;  %s76_s27 = scalar_lea.vmem %s39_s24, 64  ;;  %p81_p9 = scmp.lt.s32.totalorder %s39_s24, %s39_s24 }
  0x16   :  { %p77_p8 = scmp.ne.s32.totalorder %s39_s24, %s76_s27  ;;  %p82_p10 = scmp.lt.s32.totalorder %s76_s27, %s76_s27 }
  0x17   :  { %31 = vst [vmem:[#allocation5] sm:$0x3] %v29_v3  ;;  %32 = vst [vmem:[#allocation5 + $0x2] sm:$0x3] %v30_v4 }
  0x18   :  { %p83_p11 = por %p82_p10, %p81_p9 }
  0x1a   :  { %p84_p12 = pnand %p83_p11, %p77_p8 }
  0x1c   :  { %87 = shalt.err (!%p84_p12)
}
  0x1d   :  { %s88_s29 = scalar_lea.hbm %s156_s2, 64 }
  0x1e   :  { %p89_p13 = scmp.ne.s32.totalorder %s156_s2, %s88_s29  ;;  %p92_p0 = scmp.lt.u32.totalorder %s88_s29, %s156_s2 }
  0x20   :  { %p94_p1 = pnand %p92_p0, %p89_p13 }
  0x22   :  { %97 = shalt.err (!%p94_p1)
}
  0x23   :  { %44 = dma.vmem_to_hbm [thread:$0]  %s39_s24, 64, %s156_s2, [#allocation4], %s103_s19, %s103_s19, %s104_s20  }
  0x24   :  { %100 = dma.done.wait [#allocation4], 64  }
  0x25   :  { %101 = vsyncadd [#allocation4], 4294967232 }
  0x26   :  { %48 = vsyncpa [#allocation3], 1 }
  0x27   :  { %49 = vsyncpa [#allocation4], 1 }

</bundles_post_ra>
